<compile_context>
chip_gen: v6e
topology: v6e:2x2x1
jax: 0.10.0
libtpu: 0.0.40
codegen_flags: <defaults>
</compile_context>

<pallas_src>
import math

import jax
import jax.numpy as jnp
from jax.experimental import pallas as pl
from jax.experimental.pallas import tpu as pltpu

_BN_SCALE = 1.0 / math.sqrt(1.0 + 1e-5)   # BatchNorm1d eval with running stats (0, 1)


def _round_up(x, m):
    return ((x + m - 1) // m) * m


# -----------------------------------------------------------------------------
# Kernel 1: background matmul  gs_bg = B @ ste(W)
#   grid = (row blocks ["parallel"], K blocks ["arbitrary"])
#   The output block index depends only on the row axis, so it stays resident
#   across the K sweep and acts as the f32 accumulator.
# -----------------------------------------------------------------------------
def _prep_kernel(b_ref, w_ref, gs_ref):
    @pl.when(pl.program_id(1) == 0)
    def _():
        gs_ref[...] = jnp.zeros_like(gs_ref)

    gs_ref[...] += jnp.dot(b_ref[...], w_ref[...],
                           preferred_element_type=jnp.float32)


# -----------------------------------------------------------------------------
# Kernel 2: batch forward, tiled over N (double-buffered bf16 activation streams,
# megacore-parallel row tiles, coefficient-fused epilogue).
# -----------------------------------------------------------------------------
def _forward_kernel(xr_ref, xl_ref, wu_ref, wg_ref, cu_ref, ca_ref, cb_ref,
                    pred_ref):
    # UCell branch: (ranks already clamped to maxrank in the wrapper-side bf16
    # cast) @ RHS.  MXU consumes bf16 natively, accumulates in f32.
    r_u = jnp.dot(xr_ref[...], wu_ref[...], preferred_element_type=jnp.float32)
    # AMS branch: x_log2 @ [W | gs_bg]  (single fused matmul).
    r_a = jnp.dot(xl_ref[...], wg_ref[...], preferred_element_type=jnp.float32)

    # BatchNorm(eval) + Dropout(eval) + Linear(2H, 1) folded into two per-column
    # coefficient rows and one scalar: full-width VPU multiplies + lane sums,
    # no 1-lane-wide MXU output and no mid-vreg column splits.
    pred_ref[...] = (cb_ref[0, 0]
                     + jnp.sum(r_u * cu_ref[...], axis=-1, keepdims=True)
                     + jnp.sum(r_a * ca_ref[...], axis=-1, keepdims=True))


# -----------------------------------------------------------------------------
# Wrapper
# -----------------------------------------------------------------------------
def binary_module_forward(x_rank, x_log2, B, weight, maxrank, out_w, out_b):
    N, G = x_rank.shape
    H = weight.shape[1]
    assert x_log2.shape == (N, G) and B.shape == (G, G) and weight.shape == (G, H)
    assert maxrank.shape == (1, 1) and out_w.shape == (2 * H, 1) and out_b.shape == (1, 1)

    f32 = jnp.float32
    weight = weight.astype(f32)

    # ---- hoisted O(G*H) scalar work (plain XLA): STE forward, n, maxrank --------
    w_bin = (weight > 0.0).astype(f32)                        # straight-through fwd
    n = jnp.sum(w_bin, axis=0, keepdims=True)                 # (1, H)
    maxrank_v = (jnp.max(n) + 10.0
                 + jnp.maximum(maxrank.astype(f32)[0, 0], 0.0) * 1000.0)

    # ---- pad the gene axis so the background matmul K-tiles cleanly -------------
    TG = 512 if G >= 512 else _round_up(G, 128)
    G_pad = _round_up(G, TG)
    gp = G_pad - G
    w_bin_p = jnp.pad(w_bin, ((0, gp), (0, 0)))               # zero rows -> inert genes
    w_bf16 = w_bin_p.astype(jnp.bfloat16)                     # exact 0/1
    b_bf16 = jnp.pad(B.astype(jnp.bfloat16), ((0, gp), (0, gp)))  # exact 0/1

    # ---- prep kernel: gs_bg = B @ ste(W) (row axis shards across TCs on v7x) ----
    n_gt = G_pad // TG
    gs = pl.pallas_call(
        _prep_kernel,
        grid=(n_gt, n_gt),
        in_specs=[
            pl.BlockSpec((TG, TG), lambda r, k: (r, k)),      # B tile (bf16)
            pl.BlockSpec((TG, H), lambda r, k: (k, 0)),       # binarized W, K tile
        ],
        out_specs=pl.BlockSpec((TG, H), lambda r, k: (r, 0)),
        out_shape=jax.ShapeDtypeStruct((G_pad, H), f32),
        compiler_params=pltpu.CompilerParams(
            dimension_semantics=("parallel", "arbitrary")),
    )(b_bf16, w_bf16)

    # ---- fused output coefficients (plain XLA, O(G*H)) --------------------------
    #   pred = cb + sum(r_u * cu, -1) + sum(r_a * ca, -1)
    # NOTE: a hidden column with an empty gene set (n == 0) or zero background
    # mass yields inf/NaN here, exactly as the PyTorch module would.
    gsum = jnp.sum(gs, axis=0, keepdims=True)                 # (1, H) = gs_bg.sum(0)
    ow = out_w.astype(f32).reshape(1, 2 * H)
    ow_u, ow_a = ow[:, :H], ow[:, H:]
    inv_nm = 1.0 / (n * maxrank_v)
    cu_core = -_BN_SCALE * inv_nm * ow_u                                      # (1, H)
    ca = jnp.concatenate([_BN_SCALE * ow_a / n, -_BN_SCALE * ow_a / gsum], axis=1)
    cb = (_BN_SCALE * jnp.sum(ow_u * (1.0 + 0.5 * n * (n + 1.0) * inv_nm))
          + out_b.astype(f32)[0, 0]).reshape(1, 1)

    # Fused RHS [W | gs_bg] for the x_log2 matmul.  bf16: W exact; gs_bg counts
    # above 256 round at ~2^-8 relative.
    # TODO(synk): keep the gs_bg half in f32 if that tolerance is ever unacceptable.
    wg = jnp.concatenate([w_bin_p, gs], axis=1).astype(jnp.bfloat16)          # (G_pad, 2H)

    if 2 * H <= 128:
        # Ride-along: the UCell matmul reuses the fused RHS for free (one MXU
        # output tile either way); zero out the gs_bg half of its coefficients.
        wu = wg
        cu = jnp.concatenate([cu_core, jnp.zeros((1, H), f32)], axis=1)
    else:
        # Guard: once 2H > 128 the dead gs_bg columns would cost extra MXU output
        # tiles, so the UCell matmul falls back to a W-only RHS.
        wu = w_bf16
        cu = cu_core
    WU = wu.shape[1]

    # ---- activation streams: fold the maxrank clamp into the bf16 cast ----------
    xr = jnp.minimum(x_rank.astype(f32), maxrank_v).astype(jnp.bfloat16)
    xl = x_log2.astype(jnp.bfloat16)
    if gp:
        xr = jnp.pad(xr, ((0, 0), (0, gp)))
        xl = jnp.pad(xl, ((0, 0), (0, gp)))

    # ---- N-tile sizing from the part's actual VMEM capacity ---------------------
    try:
        vmem_cap = int(pltpu.get_tpu_info().vmem_capacity_bytes)
    except Exception:
        vmem_cap = 64 << 20                                    # conservative (v7x)
    if vmem_cap >= (96 << 20):          # v5e / v6e: 128 MiB physical VMEM
        tn_budget, vmem_limit = 80 << 20, 100 << 20
    else:                               # v7x: 64 MiB per TensorCore
        tn_budget, vmem_limit = 36 << 20, 48 << 20

    resident = 2 * G_pad * (WU + 2 * H) + 8 * (WU + 2 * H) + 4096   # bf16 RHS + coefs
    per_row = 8 * G_pad + 16 * (WU + 2 * H) + 64   # 2 bf16 streams x 2 bufs + f32 temps
    TN = 1024
    while TN > 8 and TN * per_row + resident > tn_budget:
        TN //= 2
    TN = min(TN, _round_up(N, 8))
    N_pad = _round_up(N, TN)
    if N_pad != N:
        xr = jnp.pad(xr, ((0, N_pad - N), (0, 0)))
        xl = jnp.pad(xl, ((0, N_pad - N), (0, 0)))

    # Grid-invariant RHS blocks: drop the dead second pipeline buffer when they
    # are big enough to matter (small models keep the default pipelining).
    big_resident = 2 * G_pad * (WU + 2 * H) > (4 << 20)

    def _resident_spec(cols):
        if big_resident:
            return pl.BlockSpec((G_pad, cols), lambda i: (0, 0),
                                pipeline_mode=pl.Buffered(1))
        return pl.BlockSpec((G_pad, cols), lambda i: (0, 0))

    pred = pl.pallas_call(
        _forward_kernel,
        grid=(N_pad // TN,),
        in_specs=[
            pl.BlockSpec((TN, G_pad), lambda i: (i, 0)),       # x_rank tile (bf16)
            pl.BlockSpec((TN, G_pad), lambda i: (i, 0)),       # x_log2 tile (bf16)
            _resident_spec(WU),                                # UCell RHS, resident
            _resident_spec(2 * H),                             # [W | gs_bg], resident
            pl.BlockSpec((1, WU), lambda i: (0, 0)),           # coef_u
            pl.BlockSpec((1, 2 * H), lambda i: (0, 0)),        # coef_a
            pl.BlockSpec(memory_space=pltpu.MemorySpace.SMEM),  # cb scalar (1, 1)
        ],
        out_specs=pl.BlockSpec((TN, 1), lambda i: (i, 0)),
        out_shape=jax.ShapeDtypeStruct((N_pad, 1), f32),
        compiler_params=pltpu.CompilerParams(
            dimension_semantics=("parallel",),    # shard row tiles across TCs (v7x)
            vmem_limit_bytes=vmem_limit),
    )(xr, xl, wu, wg, cu, ca, cb)

    return pred[:N]


if __name__ == "__main__":
    key = jax.random.PRNGKey(0)
    N, G, H = 16, 256, 24          # small synthetic: batch=16, input_size=256, hidden=24
    ks = jax.random.split(key, 7)

    # Parameter init mirroring the PyTorch __init__ distributions.
    weight = (-0.1 + 0.055 * jax.random.normal(ks[0], (G, H))).astype(jnp.float32)
    weight = weight.at[0, :].set(0.5)        # guarantee no empty gene set (avoids 1/0)
    maxrank = jax.random.uniform(ks[1], (1, 1), jnp.float32, 0.0, 1.0)
    bound = 1.0 / (2 * H) ** 0.5             # nn.Linear default init range
    out_w = jax.random.uniform(ks[2], (2 * H, 1), jnp.float32, -bound, bound)
    out_b = jax.random.uniform(ks[3], (1, 1), jnp.float32, -bound, bound)

    # Synthetic inputs.
    x_rank = jnp.round(jax.random.uniform(ks[4], (N, G), jnp.float32, 1.0, float(G)))
    x_log2 = jax.random.uniform(ks[5], (N, G), jnp.float32, 0.0, 8.0)
    B = (jax.random.uniform(ks[6], (G, G)) < 0.1).astype(jnp.float32)
    B = B.at[:, 0].set(1.0)                  # non-zero background mass for every gene set

    pred = jax.block_until_ready(
        binary_module_forward(x_rank, x_log2, B, weight, maxrank, out_w, out_b))
    assert pred.shape == (N, 1) and pred.dtype == jnp.float32
    assert bool(jnp.all(jnp.isfinite(pred)))

    # Pure-JAX reference (eval-mode BatchNorm / Dropout).
    def reference(xr_in, xl_in, B, weight, maxrank, out_w, out_b):
        hi = jax.lax.Precision.HIGHEST
        W = (weight > 0).astype(jnp.float32)
        n = W.sum(0, keepdims=True)
        mr = n.max() + 10.0 + jnp.maximum(maxrank, 0.0) * 1000.0
        xr = jnp.minimum(xr_in, mr)
        R = jnp.dot(xr, W, precision=hi)
        r_ucell = 1.0 - (R - n * (n + 1.0) / 2.0) / (n * mr)
        gs = jnp.dot(B, W, precision=hi)
        bg = jnp.dot(xl_in, gs, precision=hi) / gs.sum(0, keepdims=True)
        raw = jnp.dot(xl_in, W, precision=hi) / n
        r_all = jnp.concatenate([r_ucell, raw - bg], axis=1) / (1.0 + 1e-5) ** 0.5
        return jnp.dot(r_all, out_w, precision=hi) + out_b[0, 0]

    # (a) Tight check: same bf16 quantization of the activation streams as the
    #     kernel (validates the kernel + coefficient-fusion math).
    Wb = (weight > 0).astype(jnp.float32)
    mrv = Wb.sum(0).max() + 10.0 + jnp.maximum(maxrank[0, 0], 0.0) * 1000.0
    xr_q = jnp.minimum(x_rank, mrv).astype(jnp.bfloat16).astype(jnp.float32)
    xl_q = x_log2.astype(jnp.bfloat16).astype(jnp.float32)
    ref_q = reference(xr_q, xl_q, B, weight, maxrank, out_w, out_b)
    assert bool(jnp.allclose(pred, ref_q, rtol=1e-2, atol=1e-2)), \
        float(jnp.max(jnp.abs(pred - ref_q)))

    # (b) Looser check against the full f32 reference: bounds the bf16
    #     activation-streaming precision trade-off flagged in the perf review.
    ref32 = reference(x_rank, x_log2, B, weight, maxrank, out_w, out_b)
    assert bool(jnp.allclose(pred, ref32, rtol=5e-2, atol=5e-2)), \
        float(jnp.max(jnp.abs(pred - ref32)))

    print("KERNEL_OK")
</pallas_src>

<mosaic_0001>
module attributes {stable_mosaic.version = 11 : i64} {
  func.func @_prep_kernel(%arg0: i32, %arg1: i32, %arg2: memref<256x256xbf16, #tpu.memory_space<vmem>>, %arg3: memref<256x24xbf16, #tpu.memory_space<vmem>>, %arg4: memref<256x24xf32, #tpu.memory_space<vmem>>) attributes {dimension_semantics = [#tpu.dimension_semantics<parallel>, #tpu.dimension_semantics<arbitrary>], iteration_bounds = array<i64: 1, 1>, scalar_prefetch = 0 : i64, scratch_operands = 0 : i64, tpu.core_type = #tpu.core_type<tc>, window_params = [{transform_indices = @transform_0, window_bounds = array<i64: 256, 256>}, {transform_indices = @transform_1, window_bounds = array<i64: 256, 24>}, {transform_indices = @transform_2, window_bounds = array<i64: 256, 24>}]} {
    %c0_i32 = arith.constant 0 : i32
    %0 = arith.cmpi eq, %arg1, %c0_i32 : i32
    %1 = arith.extui %0 : i1 to i32
    %c0_i32_0 = arith.constant 0 : i32
    %2 = arith.cmpi ne, %1, %c0_i32_0 : i32
    scf.if %2 {
      %cst_8 = arith.constant 0.000000e+00 : f32
      %9 = vector.broadcast %cst_8 : f32 to vector<256x24xf32>
      %c0_9 = arith.constant 0 : index
      %c0_10 = arith.constant 0 : index
      %10 = vector.load %arg4[%c0_9, %c0_10] : memref<256x24xf32, #tpu.memory_space<vmem>>, vector<256x24xf32>
      tpu.vector_store %arg4[%c0_9, %c0_10], %9 {strides = array<i32>} : memref<256x24xf32, #tpu.memory_space<vmem>>, vector<256x24xf32>,
    } else {
    }
    %c0 = arith.constant 0 : index
    %c0_1 = arith.constant 0 : index
    %3 = vector.load %arg4[%c0, %c0_1] : memref<256x24xf32, #tpu.memory_space<vmem>>, vector<256x24xf32>
    %c0_2 = arith.constant 0 : index
    %c0_3 = arith.constant 0 : index
    %4 = vector.load %arg2[%c0_2, %c0_3] : memref<256x256xbf16, #tpu.memory_space<vmem>>, vector<256x256xbf16>
    %c0_4 = arith.constant 0 : index
    %c0_5 = arith.constant 0 : index
    %5 = vector.load %arg3[%c0_4, %c0_5] : memref<256x24xbf16, #tpu.memory_space<vmem>>, vector<256x24xbf16>
    %cst = arith.constant dense<0.000000e+00> : vector<256x24xf32>
    %6 = tpu.matmul %4, %5, %cst {dimension_numbers = #tpu.dot_dimension_numbers<[1], [0], [0], [1], [0, 0, 1, 1], [], []>} : vector<256x256xbf16>, vector<256x24xbf16>, vector<256x24xf32> -> vector<256x24xf32>
    %7 = arith.addf %3, %6 : vector<256x24xf32>
    %c0_6 = arith.constant 0 : index
    %c0_7 = arith.constant 0 : index
    %8 = vector.load %arg4[%c0_6, %c0_7] : memref<256x24xf32, #tpu.memory_space<vmem>>, vector<256x24xf32>
    tpu.vector_store %arg4[%c0_6, %c0_7], %7 {strides = array<i32>} : memref<256x24xf32, #tpu.memory_space<vmem>>, vector<256x24xf32>,
    return
  }
  func.func @transform_0(%arg0: i32, %arg1: i32) -> (i32, i32) {
    %c0_i32 = arith.constant 0 : i32
    return %arg0, %arg1 : i32, i32
  }
  func.func @transform_1(%arg0: i32, %arg1: i32) -> (i32, i32) {
    %c0_i32 = arith.constant 0 : i32
    %c0_i32_0 = arith.constant 0 : i32
    return %arg1, %c0_i32 : i32, i32
  }
  func.func @transform_2(%arg0: i32, %arg1: i32) -> (i32, i32) {
    %c0_i32 = arith.constant 0 : i32
    %c0_i32_0 = arith.constant 0 : i32
    return %arg0, %c0_i32 : i32, i32
  }
}

</mosaic_0001>

<bundles_post_ra>
// kernel: tpu_custom_call.1
= control target key start
LH: loop header
LB: loop body
LE: loop exit
PB: predicated region body
PF: predicated region fallthrough
CT: control target
= control target key end

     0   :  { %7 = vsyncpa [#allocation3], 0  ;;  %s912_s9 = smov [#allocation2]   ;;  %s1334_s0 = inlined_call_operand.hbm [shape: bf16[256,256], index: 0, kind: input, shape index: {}]   ;;  %s1335_s1 = inlined_call_operand.vmem [shape: bf16[256,24], index: 1, kind: input, shape index: {}]   ;;  %s1336_s2 = inlined_call_operand.vmem [shape: f32[256,24], index: 2, kind: output, shape index: {}]  }
   0x1   :  { %s13_s10 = sshll.u32 %s912_s9, 4  ;;  %s14_s10 = int_to_ptr.vmem [resolvable:$true] %s13_s10 }
   0x2   :  { %s898_s11 = scalar_lea.vmem %s14_s10, 4096  ;;  %p903_p1 = scmp.lt.s32.totalorder %s14_s10, %s14_s10 }
   0x3   :  { %p899_p0 = scmp.ne.s32.totalorder %s14_s10, %s898_s11  ;;  %p904_p2 = scmp.lt.s32.totalorder %s898_s11, %s898_s11 }
   0x5   :  { %p905_p3 = por %p904_p2, %p903_p1 }
   0x7   :  { %p906_p4 = pnand %p905_p3, %p899_p0 }
   0x9   :  { %909 = shalt.err (!%p906_p4)
}
   0xa   :  { %s913_s12 = smov 128   ;;  %s914_s13 = smov 8  }
   0xb   :  { %19 = dma.hbm_to_vmem [thread:$0]  %s1334_s0, 4096, %s14_s10, [#allocation3], %s913_s12, %s913_s12, %s914_s13  }
   0xc   :  { %910 = dma.done.wait [#allocation3], 4096  }
   0xd   :  { %911 = vsyncadd [#allocation3], 4294963200  ;;  %v826_v0 = vld [vmem:[%s1335_s1 + $0x78] sm:$0xff]   ;;  %v828_v2 = vld [vmem:[%s1335_s1 + $0x70] sm:$0xff]   ;;  %vm30_vm0 = vcmask 195584   ;;  %v915_v48 = vmov 0.0  }
   0xe   :  { %v827_v1 = vld [vmem:[%s1335_s1 + $0x38] sm:$0xff]   ;;  %694 = vmatprep.subr.bf16.mxu0 %v826_v0  ;;  %806 = vmatprep.subr.bf16.mxu1 %v826_v0  ;;  %v829_v3 = vld [vmem:[%s1335_s1 + $0x30] sm:$0xff]   ;;  %v830_v4 = vld [vmem:[%s1335_s1 + $0x68] sm:$0xff]   ;;  %31 = vst.msk [vmem:[%s1336_s2] sm:$0xff] %vm30_vm0, %v915_v48 }
   0xf   :  { %695 = vmatpush3.bf16.msra.mxu0 %v827_v1  ;;  %814 = vmatpush3.bf16.msra.mxu1 %v827_v1  ;;  %v831_v5 = vld [vmem:[%s1335_s1 + $0x28] sm:$0xff]   ;;  %v832_v6 = vld [vmem:[%s1335_s1 + $0x60] sm:$0xff]   ;;  %v834_v8 = vld [vmem:[%s1335_s1 + $0x58] sm:$0xff]   ;;  %32 = vst.msk [vmem:[%s1336_s2 + $0x8] sm:$0xff] %vm30_vm0, %v915_v48 }
  0x10   :  { %696 = vmatprep.subr.bf16.mxu0 %v828_v2  ;;  %807 = vmatprep.subr.bf16.mxu1 %v828_v2  ;;  %v833_v7 = vld [vmem:[%s1335_s1 + $0x20] sm:$0xff]   ;;  %v835_v9 = vld [vmem:[%s1335_s1 + $0x18] sm:$0xff]   ;;  %v836_v10 = vld [vmem:[%s1335_s1 + $0x50] sm:$0xff]   ;;  %33 = vst.msk [vmem:[%s1336_s2 + $0x10] sm:$0xff] %vm30_vm0, %v915_v48 }
  0x11   :  { %v844_v11 = vld [vmem:[#allocation2 + $0x4] ss:$8 sps:$4 sm:$0xff]   ;;  %v837_v13 = vld [vmem:[%s1335_s1 + $0x10] sm:$0xff]   ;;  %v842_v18 = vld [vmem:[#allocation2] ss:$8 sps:$4 sm:$0xff]   ;;  %34 = vst.msk [vmem:[%s1336_s2 + $0x18] sm:$0xff] %vm30_vm0, %v915_v48 }
  0x12   :  { %v847_v12 = vld [vmem:[#allocation2 + $0x84] ss:$8 sps:$4 sm:$0xff]   ;;  %447 = vmatprep.mubr.bf16.mxu0 %v844_v11  ;;  %v845_v19 = vld [vmem:[#allocation2 + $0x80] ss:$8 sps:$4 sm:$0xff]   ;;  %v848_v20 = vld [vmem:[#allocation2 + $0x14] ss:$8 sps:$4 sm:$0xff]  }
  0x13   :  { %697 = vmatpush3.bf16.msra.mxu0 %v829_v3  ;;  %815 = vmatpush3.bf16.msra.mxu1 %v829_v3  ;;  %v838_v14 = vld [vmem:[%s1335_s1 + $0x48] sm:$0xff]   ;;  %v840_v16 = vld [vmem:[%s1335_s1 + $0x40] sm:$0xff]   ;;  %v850_v21 = vld [vmem:[#allocation2 + $0x94] ss:$8 sps:$4 sm:$0xff]   ;;  %35 = vst.msk [vmem:[%s1336_s2 + $0x20] sm:$0xff] %vm30_vm0, %v915_v48 }
  0x14   :  { %698 = vmatprep.subr.bf16.mxu0 %v830_v4  ;;  %808 = vmatprep.subr.bf16.mxu1 %v830_v4  ;;  %v839_v15 = vld [vmem:[%s1335_s1 + $0x8] sm:$0xff]   ;;  %v841_v17 = vld [vmem:[%s1335_s1] sm:$0xff]   ;;  %v852_v22 = vld [vmem:[#allocation2 + $0x10] ss:$8 sps:$4 sm:$0xff]   ;;  %36 = vst.msk [vmem:[%s1336_s2 + $0x28] sm:$0xff] %vm30_vm0, %v915_v48 }
  0x15   :  { %511 = vmatprep.mubr.bf16.mxu1 %v847_v12  ;;  %v853_v23 = vld [vmem:[#allocation2 + $0x90] ss:$8 sps:$4 sm:$0xff]   ;;  %v854_v24 = vld [vmem:[#allocation2 + $0x24] ss:$8 sps:$4 sm:$0xff]   ;;  %v858_v26 = vld [vmem:[#allocation2 + $0x20] ss:$8 sps:$4 sm:$0xff]  }
  0x16   :  { %v856_v25 = vld [vmem:[#allocation2 + $0xa4] ss:$8 sps:$4 sm:$0xff]   ;;  %v859_v27 = vld [vmem:[#allocation2 + $0xa0] ss:$8 sps:$4 sm:$0xff]   ;;  %v860_v28 = vld [vmem:[#allocation2 + $0x34] ss:$8 sps:$4 sm:$0xff]  }
  0x17   :  { %699 = vmatpush3.bf16.msra.mxu0 %v831_v5  ;;  %816 = vmatpush3.bf16.msra.mxu1 %v831_v5  ;;  %v862_v29 = vld [vmem:[#allocation2 + $0xb4] ss:$8 sps:$4 sm:$0xff]   ;;  %v864_v30 = vld [vmem:[#allocation2 + $0x30] ss:$8 sps:$4 sm:$0xff]   ;;  %v866_v32 = vld [vmem:[#allocation2 + $0x44] ss:$8 sps:$4 sm:$0xff]  }
  0x18   :  { %700 = vmatprep.subr.bf16.mxu0 %v832_v6  ;;  %809 = vmatprep.subr.bf16.mxu1 %v832_v6  ;;  %v865_v31 = vld [vmem:[#allocation2 + $0xb0] ss:$8 sps:$4 sm:$0xff]   ;;  %v868_v33 = vld [vmem:[#allocation2 + $0xc4] ss:$8 sps:$4 sm:$0xff]   ;;  %v870_v34 = vld [vmem:[#allocation2 + $0x40] ss:$8 sps:$4 sm:$0xff]  }
  0x19   :  { %v871_v35 = vld [vmem:[#allocation2 + $0xc0] ss:$8 sps:$4 sm:$0xff]   ;;  %v872_v36 = vld [vmem:[#allocation2 + $0x54] ss:$8 sps:$4 sm:$0xff]   ;;  %v876_v38 = vld [vmem:[#allocation2 + $0x50] ss:$8 sps:$4 sm:$0xff]  }
  0x1a   :  { %v874_v37 = vld [vmem:[#allocation2 + $0xd4] ss:$8 sps:$4 sm:$0xff]   ;;  %v877_v39 = vld [vmem:[#allocation2 + $0xd0] ss:$8 sps:$4 sm:$0xff]   ;;  %v878_v40 = vld [vmem:[#allocation2 + $0x64] ss:$8 sps:$4 sm:$0xff]  }
  0x1b   :  { %701 = vmatpush3.bf16.msra.mxu0 %v833_v7  ;;  %817 = vmatpush3.bf16.msra.mxu1 %v833_v7  ;;  %v880_v41 = vld [vmem:[#allocation2 + $0xe4] ss:$8 sps:$4 sm:$0xff]   ;;  %v882_v42 = vld [vmem:[#allocation2 + $0x60] ss:$8 sps:$4 sm:$0xff]   ;;  %v884_v44 = vld [vmem:[#allocation2 + $0x74] ss:$8 sps:$4 sm:$0xff]  }
  0x1c   :  { %702 = vmatprep.subr.bf16.mxu0 %v834_v8  ;;  %810 = vmatprep.subr.bf16.mxu1 %v834_v8  ;;  %v883_v43 = vld [vmem:[#allocation2 + $0xe0] ss:$8 sps:$4 sm:$0xff]   ;;  %v886_v45 = vld [vmem:[#allocation2 + $0xf4] ss:$8 sps:$4 sm:$0xff]   ;;  %v888_v46 = vld [vmem:[#allocation2 + $0x70] ss:$8 sps:$4 sm:$0xff]  }
  0x1d   :  { %v889_v47 = vld [vmem:[#allocation2 + $0xf0] ss:$8 sps:$4 sm:$0xff]   ;;  %37 = vst.msk [vmem:[%s1336_s2 + $0x30] sm:$0xff] %vm30_vm0, %v915_v48  ;;  %38 = vst.msk [vmem:[%s1336_s2 + $0x38] sm:$0xff] %vm30_vm0, %v915_v48  ;;  %v63_v51 = vld [vmem:[%s1336_s2] sm:$0xff] }
  0x1e   :  { %39 = vst.msk [vmem:[%s1336_s2 + $0x40] sm:$0xff] %vm30_vm0, %v915_v48  ;;  %40 = vst.msk [vmem:[%s1336_s2 + $0x48] sm:$0xff] %vm30_vm0, %v915_v48  ;;  %v64_v61 = vld [vmem:[%s1336_s2 + $0x8] sm:$0xff]  ;;  %v65_v7 = vld [vmem:[%s1336_s2 + $0x10] sm:$0xff] }
  0x1f   :  { %703 = vmatpush3.bf16.msra.mxu0 %v835_v9  ;;  %818 = vmatpush3.bf16.msra.mxu1 %v835_v9  ;;  %41 = vst.msk [vmem:[%s1336_s2 + $0x50] sm:$0xff] %vm30_vm0, %v915_v48  ;;  %42 = vst.msk [vmem:[%s1336_s2 + $0x58] sm:$0xff] %vm30_vm0, %v915_v48 }
  0x20   :  { %704 = vmatprep.subr.bf16.mxu0 %v836_v10  ;;  %811 = vmatprep.subr.bf16.mxu1 %v836_v10  ;;  %43 = vst.msk [vmem:[%s1336_s2 + $0x60] sm:$0xff] %vm30_vm0, %v915_v48  ;;  %44 = vst.msk [vmem:[%s1336_s2 + $0x68] sm:$0xff] %vm30_vm0, %v915_v48 }
  0x21   :  { %45 = vst.msk [vmem:[%s1336_s2 + $0x70] sm:$0xff] %vm30_vm0, %v915_v48  ;;  %46 = vst.msk [vmem:[%s1336_s2 + $0x78] sm:$0xff] %vm30_vm0, %v915_v48 }
  0x22   :  { %47 = vst.msk [vmem:[%s1336_s2 + $0x80] sm:$0xff] %vm30_vm0, %v915_v48  ;;  %48 = vst.msk [vmem:[%s1336_s2 + $0x88] sm:$0xff] %vm30_vm0, %v915_v48 }
  0x23   :  { %705 = vmatpush3.bf16.msra.mxu0 %v837_v13  ;;  %819 = vmatpush3.bf16.msra.mxu1 %v837_v13  ;;  %49 = vst.msk [vmem:[%s1336_s2 + $0x90] sm:$0xff] %vm30_vm0, %v915_v48  ;;  %50 = vst.msk [vmem:[%s1336_s2 + $0x98] sm:$0xff] %vm30_vm0, %v915_v48 }
  0x24   :  { %706 = vmatprep.subr.bf16.mxu0 %v838_v14  ;;  %812 = vmatprep.subr.bf16.mxu1 %v838_v14  ;;  %51 = vst.msk [vmem:[%s1336_s2 + $0xa0] sm:$0xff] %vm30_vm0, %v915_v48  ;;  %52 = vst.msk [vmem:[%s1336_s2 + $0xa8] sm:$0xff] %vm30_vm0, %v915_v48 }
  0x25   :  { %53 = vst.msk [vmem:[%s1336_s2 + $0xb0] sm:$0xff] %vm30_vm0, %v915_v48  ;;  %54 = vst.msk [vmem:[%s1336_s2 + $0xb8] sm:$0xff] %vm30_vm0, %v915_v48 }
  0x26   :  { %55 = vst.msk [vmem:[%s1336_s2 + $0xc0] sm:$0xff] %vm30_vm0, %v915_v48  ;;  %56 = vst.msk [vmem:[%s1336_s2 + $0xc8] sm:$0xff] %vm30_vm0, %v915_v48 }
  0x27   :  { %707 = vmatpush3.bf16.msra.mxu0 %v839_v15  ;;  %820 = vmatpush3.bf16.msra.mxu1 %v839_v15  ;;  %57 = vst.msk [vmem:[%s1336_s2 + $0xd0] sm:$0xff] %vm30_vm0, %v915_v48  ;;  %58 = vst.msk [vmem:[%s1336_s2 + $0xd8] sm:$0xff] %vm30_vm0, %v915_v48 }
  0x28   :  { %708 = vmatprep.subr.bf16.mxu0 %v840_v16  ;;  %813 = vmatprep.subr.bf16.mxu1 %v840_v16  ;;  %59 = vst.msk [vmem:[%s1336_s2 + $0xe0] sm:$0xff] %vm30_vm0, %v915_v48  ;;  %60 = vst.msk [vmem:[%s1336_s2 + $0xe8] sm:$0xff] %vm30_vm0, %v915_v48 }
  0x29   :  { %61 = vst.msk [vmem:[%s1336_s2 + $0xf0] sm:$0xff] %vm30_vm0, %v915_v48  ;;  %62 = vst.msk [vmem:[%s1336_s2 + $0xf8] sm:$0xff] %vm30_vm0, %v915_v48  ;;  %v79_v53 = vld [vmem:[%s1336_s2 + $0x80] sm:$0xff]  ;;  %v80_v63 = vld [vmem:[%s1336_s2 + $0x88] sm:$0xff] }
  0x2a   :  { %v81_v9 = vld [vmem:[%s1336_s2 + $0x90] sm:$0xff] }
  0x2b   :  { %709 = vmatpush3.bf16.msra.mxu0 %v841_v17  ;;  %821 = vmatpush3.bf16.msra.mxu1 %v841_v17  ;;  %v66_v17 = vld [vmem:[%s1336_s2 + $0x18] sm:$0xff] }
  0x2e   :  { %448 = vmatmul.mubr.bf16.vlgmr.msra.gmra.mxu0 %v842_v18  ;;  %512 = vmatmul.mubr.bf16.vlgmr.msra.gmra.mxu1 %v845_v19  ;;  %v82_v19 = vld [vmem:[%s1336_s2 + $0x98] sm:$0xff] }
  0x2f   :  { %455 = vmatprep.mubr.bf16.mxu0 %v848_v20  ;;  %519 = vmatprep.mubr.bf16.mxu1 %v850_v21 }
  0x36   :  { %456 = vmatmul.mubr.bf16.gmra.mxu0 %v852_v22  ;;  %520 = vmatmul.mubr.bf16.gmra.mxu1 %v853_v23 }
  0x37   :  { %463 = vmatprep.mubr.bf16.mxu0 %v854_v24  ;;  %527 = vmatprep.mubr.bf16.mxu1 %v856_v25 }
  0x3e   :  { %464 = vmatmul.mubr.bf16.gmra.mxu0 %v858_v26  ;;  %528 = vmatmul.mubr.bf16.gmra.mxu1 %v859_v27  ;;  %v67_v27 = vld [vmem:[%s1336_s2 + $0x20] sm:$0xff] }
  0x3f   :  { %471 = vmatprep.mubr.bf16.mxu0 %v860_v28  ;;  %535 = vmatprep.mubr.bf16.mxu1 %v862_v29  ;;  %v83_v29 = vld [vmem:[%s1336_s2 + $0xa0] sm:$0xff] }
  0x46   :  { %472 = vmatmul.mubr.bf16.gmra.mxu0 %v864_v30  ;;  %536 = vmatmul.mubr.bf16.gmra.mxu1 %v865_v31 }
  0x47   :  { %479 = vmatprep.mubr.bf16.mxu0 %v866_v32  ;;  %543 = vmatprep.mubr.bf16.mxu1 %v868_v33 }
  0x4e   :  { %480 = vmatmul.mubr.bf16.gmra.mxu0 %v870_v34  ;;  %544 = vmatmul.mubr.bf16.gmra.mxu1 %v871_v35 }
  0x4f   :  { %487 = vmatprep.mubr.bf16.mxu0 %v872_v36  ;;  %551 = vmatprep.mubr.bf16.mxu1 %v874_v37  ;;  %v68_v37 = vld [vmem:[%s1336_s2 + $0x28] sm:$0xff] }
  0x56   :  { %488 = vmatmul.mubr.bf16.gmra.mxu0 %v876_v38  ;;  %552 = vmatmul.mubr.bf16.gmra.mxu1 %v877_v39  ;;  %v84_v39 = vld [vmem:[%s1336_s2 + $0xa8] sm:$0xff] }
  0x57   :  { %495 = vmatprep.mubr.bf16.mxu0 %v878_v40  ;;  %559 = vmatprep.mubr.bf16.mxu1 %v880_v41 }
  0x5e   :  { %496 = vmatmul.mubr.bf16.gmra.mxu0 %v882_v42  ;;  %560 = vmatmul.mubr.bf16.gmra.mxu1 %v883_v43 }
  0x5f   :  { %503 = vmatprep.mubr.bf16.mxu0 %v884_v44  ;;  %567 = vmatprep.mubr.bf16.mxu1 %v886_v45 }
  0x66   :  { %504 = vmatmul.mubr.bf16.gmra.mxu0 %v888_v46  ;;  %568 = vmatmul.mubr.bf16.gmra.mxu1 %v889_v47  ;;  %v69_v47 = vld [vmem:[%s1336_s2 + $0x30] sm:$0xff] }
  0xee   :  { %v710_v49 = vpop.f32.mrf.mxu0  ;;  %v758_v50 = vpop.f32.mrf.mxu1 }
  0xf0   :  { %v711_v52 = vpop.f32.mrf.mxu0  ;;  %v759_v54 = vpop.f32.mrf.mxu1 }
  0xf1   :  { %v712_v55 = vadd.f32 %v711_v52, %v710_v49  ;;  %v760_v56 = vadd.f32 %v759_v54, %v758_v50  ;;  %v85_v49 = vld [vmem:[%s1336_s2 + $0xb0] sm:$0xff] }
  0xf2   :  { %v713_v57 = vpop.f32.mrf.mxu0  ;;  %v761_v58 = vpop.f32.mrf.mxu1 }
  0xf3   :  { %v576_v59 = vadd.f32 %v712_v55, %v63_v51  ;;  %v592_v60 = vadd.f32 %v760_v56, %v79_v53 }
  0xf4   :  { %v714_v62 = vpop.f32.mrf.mxu0  ;;  %v762_v0 = vpop.f32.mrf.mxu1 }
  0xf5   :  { %609 = vst.msk [vmem:[%s1336_s2] sm:$0xff] %vm30_vm0, %v576_v59  ;;  %625 = vst.msk [vmem:[%s1336_s2 + $0x80] sm:$0xff] %vm30_vm0, %v592_v60  ;;  %v715_v1 = vadd.f32 %v714_v62, %v713_v57  ;;  %v763_v2 = vadd.f32 %v762_v0, %v761_v58  ;;  %v70_v57 = vld [vmem:[%s1336_s2 + $0x38] sm:$0xff] }
  0xf6   :  { %v716_v3 = vpop.f32.mrf.mxu0  ;;  %v764_v4 = vpop.f32.mrf.mxu1  ;;  %v86_v59 = vld [vmem:[%s1336_s2 + $0xb8] sm:$0xff] }
  0xf7   :  { %v577_v5 = vadd.f32 %v715_v1, %v64_v61  ;;  %v593_v6 = vadd.f32 %v763_v2, %v80_v63 }
  0xf8   :  { %v717_v8 = vpop.f32.mrf.mxu0  ;;  %v765_v10 = vpop.f32.mrf.mxu1 }
  0xf9   :  { %610 = vst.msk [vmem:[%s1336_s2 + $0x8] sm:$0xff] %vm30_vm0, %v577_v5  ;;  %626 = vst.msk [vmem:[%s1336_s2 + $0x88] sm:$0xff] %vm30_vm0, %v593_v6  ;;  %v718_v11 = vadd.f32 %v717_v8, %v716_v3  ;;  %v766_v12 = vadd.f32 %v765_v10, %v764_v4  ;;  %v71_v3 = vld [vmem:[%s1336_s2 + $0x40] sm:$0xff] }
  0xfa   :  { %v719_v13 = vpop.f32.mrf.mxu0  ;;  %v767_v14 = vpop.f32.mrf.mxu1  ;;  %v87_v5 = vld [vmem:[%s1336_s2 + $0xc0] sm:$0xff] }
  0xfb   :  { %v578_v15 = vadd.f32 %v718_v11, %v65_v7  ;;  %v594_v16 = vadd.f32 %v766_v12, %v81_v9 }
  0xfc   :  { %v720_v18 = vpop.f32.mrf.mxu0  ;;  %v768_v20 = vpop.f32.mrf.mxu1 }
  0xfd   :  { %611 = vst.msk [vmem:[%s1336_s2 + $0x10] sm:$0xff] %vm30_vm0, %v578_v15  ;;  %627 = vst.msk [vmem:[%s1336_s2 + $0x90] sm:$0xff] %vm30_vm0, %v594_v16  ;;  %v721_v21 = vadd.f32 %v720_v18, %v719_v13  ;;  %v769_v22 = vadd.f32 %v768_v20, %v767_v14  ;;  %v72_v13 = vld [vmem:[%s1336_s2 + $0x48] sm:$0xff] }
  0xfe   :  { %v722_v23 = vpop.f32.mrf.mxu0  ;;  %v770_v24 = vpop.f32.mrf.mxu1  ;;  %v88_v15 = vld [vmem:[%s1336_s2 + $0xc8] sm:$0xff] }
  0xff   :  { %v579_v25 = vadd.f32 %v721_v21, %v66_v17  ;;  %v595_v26 = vadd.f32 %v769_v22, %v82_v19 }
 0x100   :  { %v723_v28 = vpop.f32.mrf.mxu0  ;;  %v771_v30 = vpop.f32.mrf.mxu1 }
 0x101   :  { %612 = vst.msk [vmem:[%s1336_s2 + $0x18] sm:$0xff] %vm30_vm0, %v579_v25  ;;  %628 = vst.msk [vmem:[%s1336_s2 + $0x98] sm:$0xff] %vm30_vm0, %v595_v26  ;;  %v724_v31 = vadd.f32 %v723_v28, %v722_v23  ;;  %v772_v32 = vadd.f32 %v771_v30, %v770_v24  ;;  %v73_v23 = vld [vmem:[%s1336_s2 + $0x50] sm:$0xff] }
 0x102   :  { %v725_v33 = vpop.f32.mrf.mxu0  ;;  %v773_v34 = vpop.f32.mrf.mxu1  ;;  %v89_v25 = vld [vmem:[%s1336_s2 + $0xd0] sm:$0xff] }
 0x103   :  { %v580_v35 = vadd.f32 %v724_v31, %v67_v27  ;;  %v596_v36 = vadd.f32 %v772_v32, %v83_v29 }
 0x104   :  { %v726_v38 = vpop.f32.mrf.mxu0  ;;  %v774_v40 = vpop.f32.mrf.mxu1 }
 0x105   :  { %613 = vst.msk [vmem:[%s1336_s2 + $0x20] sm:$0xff] %vm30_vm0, %v580_v35  ;;  %629 = vst.msk [vmem:[%s1336_s2 + $0xa0] sm:$0xff] %vm30_vm0, %v596_v36  ;;  %v727_v41 = vadd.f32 %v726_v38, %v725_v33  ;;  %v775_v42 = vadd.f32 %v774_v40, %v773_v34  ;;  %v74_v33 = vld [vmem:[%s1336_s2 + $0x58] sm:$0xff] }
 0x106   :  { %v728_v43 = vpop.f32.mrf.mxu0  ;;  %v776_v44 = vpop.f32.mrf.mxu1  ;;  %v90_v35 = vld [vmem:[%s1336_s2 + $0xd8] sm:$0xff] }
 0x107   :  { %v581_v45 = vadd.f32 %v727_v41, %v68_v37  ;;  %v597_v46 = vadd.f32 %v775_v42, %v84_v39 }
 0x108   :  { %v729_v48 = vpop.f32.mrf.mxu0  ;;  %v777_v50 = vpop.f32.mrf.mxu1 }
 0x109   :  { %614 = vst.msk [vmem:[%s1336_s2 + $0x28] sm:$0xff] %vm30_vm0, %v581_v45  ;;  %630 = vst.msk [vmem:[%s1336_s2 + $0xa8] sm:$0xff] %vm30_vm0, %v597_v46  ;;  %v730_v51 = vadd.f32 %v729_v48, %v728_v43  ;;  %v778_v52 = vadd.f32 %v777_v50, %v776_v44  ;;  %v75_v43 = vld [vmem:[%s1336_s2 + $0x60] sm:$0xff] }
 0x10a   :  { %v731_v53 = vpop.f32.mrf.mxu0  ;;  %v779_v54 = vpop.f32.mrf.mxu1  ;;  %v91_v45 = vld [vmem:[%s1336_s2 + $0xe0] sm:$0xff] }
 0x10b   :  { %v582_v55 = vadd.f32 %v730_v51, %v69_v47  ;;  %v598_v56 = vadd.f32 %v778_v52, %v85_v49 }
 0x10c   :  { %v732_v58 = vpop.f32.mrf.mxu0  ;;  %v780_v60 = vpop.f32.mrf.mxu1 }
 0x10d   :  { %615 = vst.msk [vmem:[%s1336_s2 + $0x30] sm:$0xff] %vm30_vm0, %v582_v55  ;;  %631 = vst.msk [vmem:[%s1336_s2 + $0xb0] sm:$0xff] %vm30_vm0, %v598_v56  ;;  %v733_v61 = vadd.f32 %v732_v58, %v731_v53  ;;  %v781_v62 = vadd.f32 %v780_v60, %v779_v54  ;;  %v76_v53 = vld [vmem:[%s1336_s2 + $0x68] sm:$0xff] }
 0x10e   :  { %v734_v63 = vpop.f32.mrf.mxu0  ;;  %v782_v0 = vpop.f32.mrf.mxu1  ;;  %v92_v55 = vld [vmem:[%s1336_s2 + $0xe8] sm:$0xff] }
 0x10f   :  { %v583_v1 = vadd.f32 %v733_v61, %v70_v57  ;;  %v599_v2 = vadd.f32 %v781_v62, %v86_v59 }
 0x110   :  { %v735_v4 = vpop.f32.mrf.mxu0  ;;  %v783_v6 = vpop.f32.mrf.mxu1 }
 0x111   :  { %616 = vst.msk [vmem:[%s1336_s2 + $0x38] sm:$0xff] %vm30_vm0, %v583_v1  ;;  %632 = vst.msk [vmem:[%s1336_s2 + $0xb8] sm:$0xff] %vm30_vm0, %v599_v2  ;;  %v736_v7 = vadd.f32 %v735_v4, %v734_v63  ;;  %v784_v8 = vadd.f32 %v783_v6, %v782_v0  ;;  %v77_v63 = vld [vmem:[%s1336_s2 + $0x70] sm:$0xff] }
 0x112   :  { %v737_v9 = vpop.f32.mrf.mxu0  ;;  %v785_v10 = vpop.f32.mrf.mxu1  ;;  %v93_v1 = vld [vmem:[%s1336_s2 + $0xf0] sm:$0xff] }
 0x113   :  { %v584_v11 = vadd.f32 %v736_v7, %v71_v3  ;;  %v600_v12 = vadd.f32 %v784_v8, %v87_v5 }
 0x114   :  { %v738_v14 = vpop.f32.mrf.mxu0  ;;  %v786_v16 = vpop.f32.mrf.mxu1 }
 0x115   :  { %617 = vst.msk [vmem:[%s1336_s2 + $0x40] sm:$0xff] %vm30_vm0, %v584_v11  ;;  %633 = vst.msk [vmem:[%s1336_s2 + $0xc0] sm:$0xff] %vm30_vm0, %v600_v12  ;;  %v739_v17 = vadd.f32 %v738_v14, %v737_v9  ;;  %v787_v18 = vadd.f32 %v786_v16, %v785_v10  ;;  %v78_v9 = vld [vmem:[%s1336_s2 + $0x78] sm:$0xff] }
 0x116   :  { %v740_v19 = vpop.f32.mrf.mxu0  ;;  %v788_v20 = vpop.f32.mrf.mxu1  ;;  %v94_v11 = vld [vmem:[%s1336_s2 + $0xf8] sm:$0xff] }
 0x117   :  { %v585_v21 = vadd.f32 %v739_v17, %v72_v13  ;;  %v601_v22 = vadd.f32 %v787_v18, %v88_v15 }
 0x118   :  { %v741_v24 = vpop.f32.mrf.mxu0  ;;  %v789_v26 = vpop.f32.mrf.mxu1 }
 0x119   :  { %618 = vst.msk [vmem:[%s1336_s2 + $0x48] sm:$0xff] %vm30_vm0, %v585_v21  ;;  %634 = vst.msk [vmem:[%s1336_s2 + $0xc8] sm:$0xff] %vm30_vm0, %v601_v22  ;;  %v742_v27 = vadd.f32 %v741_v24, %v740_v19  ;;  %v790_v28 = vadd.f32 %v789_v26, %v788_v20 }
 0x11a   :  { %v743_v29 = vpop.f32.mrf.mxu0  ;;  %v791_v30 = vpop.f32.mrf.mxu1 }
 0x11b   :  { %v586_v31 = vadd.f32 %v742_v27, %v73_v23  ;;  %v602_v32 = vadd.f32 %v790_v28, %v89_v25 }
 0x11c   :  { %v744_v34 = vpop.f32.mrf.mxu0  ;;  %v792_v36 = vpop.f32.mrf.mxu1 }
 0x11d   :  { %619 = vst.msk [vmem:[%s1336_s2 + $0x50] sm:$0xff] %vm30_vm0, %v586_v31  ;;  %635 = vst.msk [vmem:[%s1336_s2 + $0xd0] sm:$0xff] %vm30_vm0, %v602_v32  ;;  %v745_v37 = vadd.f32 %v744_v34, %v743_v29  ;;  %v793_v38 = vadd.f32 %v792_v36, %v791_v30 }
 0x11e   :  { %v746_v39 = vpop.f32.mrf.mxu0  ;;  %v794_v40 = vpop.f32.mrf.mxu1 }
 0x11f   :  { %v587_v41 = vadd.f32 %v745_v37, %v74_v33  ;;  %v603_v42 = vadd.f32 %v793_v38, %v90_v35 }
 0x120   :  { %v747_v44 = vpop.f32.mrf.mxu0  ;;  %v795_v46 = vpop.f32.mrf.mxu1 }
 0x121   :  { %620 = vst.msk [vmem:[%s1336_s2 + $0x58] sm:$0xff] %vm30_vm0, %v587_v41  ;;  %636 = vst.msk [vmem:[%s1336_s2 + $0xd8] sm:$0xff] %vm30_vm0, %v603_v42  ;;  %v748_v47 = vadd.f32 %v747_v44, %v746_v39  ;;  %v796_v48 = vadd.f32 %v795_v46, %v794_v40 }
 0x122   :  { %v749_v49 = vpop.f32.mrf.mxu0  ;;  %v797_v50 = vpop.f32.mrf.mxu1 }
 0x123   :  { %v588_v51 = vadd.f32 %v748_v47, %v75_v43  ;;  %v604_v52 = vadd.f32 %v796_v48, %v91_v45 }
 0x124   :  { %v750_v54 = vpop.f32.mrf.mxu0  ;;  %v798_v56 = vpop.f32.mrf.mxu1 }
 0x125   :  { %621 = vst.msk [vmem:[%s1336_s2 + $0x60] sm:$0xff] %vm30_vm0, %v588_v51  ;;  %637 = vst.msk [vmem:[%s1336_s2 + $0xe0] sm:$0xff] %vm30_vm0, %v604_v52  ;;  %v751_v57 = vadd.f32 %v750_v54, %v749_v49  ;;  %v799_v58 = vadd.f32 %v798_v56, %v797_v50 }
 0x126   :  { %v752_v59 = vpop.f32.mrf.mxu0  ;;  %v800_v60 = vpop.f32.mrf.mxu1 }
 0x127   :  { %v589_v61 = vadd.f32 %v751_v57, %v76_v53  ;;  %v605_v62 = vadd.f32 %v799_v58, %v92_v55 }
 0x128   :  { %v753_v0 = vpop.f32.mrf.mxu0  ;;  %v801_v2 = vpop.f32.mrf.mxu1 }
 0x129   :  { %622 = vst.msk [vmem:[%s1336_s2 + $0x68] sm:$0xff] %vm30_vm0, %v589_v61  ;;  %638 = vst.msk [vmem:[%s1336_s2 + $0xe8] sm:$0xff] %vm30_vm0, %v605_v62  ;;  %v754_v3 = vadd.f32 %v753_v0, %v752_v59  ;;  %v802_v4 = vadd.f32 %v801_v2, %v800_v60 }
 0x12a   :  { %v755_v5 = vpop.f32.mrf.mxu0  ;;  %v803_v6 = vpop.f32.mrf.mxu1 }
 0x12b   :  { %v590_v7 = vadd.f32 %v754_v3, %v77_v63  ;;  %v606_v8 = vadd.f32 %v802_v4, %v93_v1 }
 0x12c   :  { %v756_v10 = vpop.f32.mrf.mxu0  ;;  %v804_v12 = vpop.f32.mrf.mxu1 }
 0x12d   :  { %623 = vst.msk [vmem:[%s1336_s2 + $0x70] sm:$0xff] %vm30_vm0, %v590_v7  ;;  %639 = vst.msk [vmem:[%s1336_s2 + $0xf0] sm:$0xff] %vm30_vm0, %v606_v8  ;;  %v757_v13 = vadd.f32 %v756_v10, %v755_v5  ;;  %v805_v14 = vadd.f32 %v804_v12, %v803_v6 }
 0x12f   :  { %v591_v15 = vadd.f32 %v757_v13, %v78_v9  ;;  %v607_v16 = vadd.f32 %v805_v14, %v94_v11 }
 0x131   :  { %624 = vst.msk [vmem:[%s1336_s2 + $0x78] sm:$0xff] %vm30_vm0, %v591_v15  ;;  %640 = vst.msk [vmem:[%s1336_s2 + $0xf8] sm:$0xff] %vm30_vm0, %v607_v16 }
 0x132   :  { %645 = vsyncpa [#allocation3], 1 }

</bundles_post_ra>
